<compile_context>
chip_gen: v6e
topology: v6e:2x2x1
jax: 0.10.0
libtpu: 0.0.40
codegen_flags: <defaults>
</compile_context>

<pallas_src>
import jax
import jax.numpy as jnp
from jax.experimental import pallas as pl
from jax.experimental.pallas import tpu as pltpu

_MIB = 1024 * 1024
_LANE_CANDIDATES = (2048, 1024, 512, 256, 128)


def _sublane_multiple(dtype):
    # Packed-sublane multiple: f32 -> 8, bf16/f16 -> 16, int8/fp8 -> 32.
    return {4: 8, 2: 16, 1: 32}.get(jnp.dtype(dtype).itemsize, 8)


def _swish_kernel(x_ref, o_ref):
    x = x_ref[...]
    if x.dtype == jnp.float32:
        o_ref[...] = x * jax.nn.sigmoid(x)
    else:
        # Sub-f32: compute in f32. exp and the approximate reciprocal both run
        # on the EUP slot, keeping the VPU free (kernel stays HBM-bound).
        xf = x.astype(jnp.float32)
        sig = pl.reciprocal(1.0 + jnp.exp(-xf), approx=True)
        o_ref[...] = (xf * sig).astype(o_ref.dtype)


def _pick_lane(n):
    for lane in _LANE_CANDIDATES:
        if n % lane == 0:
            return lane
    return None


def _min_steps(total_bytes, target_block_bytes):
    if total_bytes > 2 * target_block_bytes:
        return 4  # >= 2 blocks per TensorCore on v7x, pipelined everywhere
    if total_bytes > target_block_bytes:
        return 2
    return 1


def _compiler_params(block_bytes):
    # in + out double-buffered -> ~4x block bytes resident, plus margin.
    vmem_limit = int(max(16 * _MIB, 4 * block_bytes + 4 * _MIB))
    return pltpu.CompilerParams(
        dimension_semantics=("parallel",),
        vmem_limit_bytes=vmem_limit,
    )


def _run_2d(x2d, target_block_bytes, donate_input):
    rows, lane = x2d.shape
    itemsize = jnp.dtype(x2d.dtype).itemsize
    sub = _sublane_multiple(x2d.dtype)
    bytes_per_row = lane * itemsize
    total_bytes = rows * bytes_per_row

    if rows <= sub or total_bytes <= target_block_bytes:
        tile_rows = rows  # single full-extent block
    else:
        steps = _min_steps(total_bytes, target_block_bytes)
        cap_rows = max(sub, (target_block_bytes // bytes_per_row) // sub * sub)
        per_step = max(sub, (rows // steps) // sub * sub)
        tile_rows = min(cap_rows, per_step)

    grid = (pl.cdiv(rows, tile_rows),)
    kwargs = {"input_output_aliases": {0: 0}} if donate_input else {}

    return pl.pallas_call(
        _swish_kernel,
        out_shape=jax.ShapeDtypeStruct((rows, lane), x2d.dtype),
        grid=grid,
        in_specs=[pl.BlockSpec((tile_rows, lane), lambda i: (i, 0))],
        out_specs=pl.BlockSpec((tile_rows, lane), lambda i: (i, 0)),
        compiler_params=_compiler_params(tile_rows * bytes_per_row),
        **kwargs,
    )(x2d)


def _run_1d(x1d, target_block_bytes, donate_input):
    (n,) = x1d.shape
    itemsize = jnp.dtype(x1d.dtype).itemsize
    unit = 128 * _sublane_multiple(x1d.dtype)  # whole packed (sub, 128) tiles
    total_bytes = n * itemsize

    if n <= 128 or total_bytes <= target_block_bytes:
        block_n = n  # single full-extent block
    else:
        steps = _min_steps(total_bytes, target_block_bytes)
        cap = max(unit, (target_block_bytes // itemsize) // unit * unit)
        per_step = max(unit, (n // steps) // unit * unit)
        block_n = min(cap, per_step)

    grid = (pl.cdiv(n, block_n),)
    kwargs = {"input_output_aliases": {0: 0}} if donate_input else {}

    return pl.pallas_call(
        _swish_kernel,
        out_shape=jax.ShapeDtypeStruct((n,), x1d.dtype),
        grid=grid,
        in_specs=[pl.BlockSpec((block_n,), lambda i: (i,))],
        out_specs=pl.BlockSpec((block_n,), lambda i: (i,)),
        compiler_params=_compiler_params(block_n * itemsize),
        **kwargs,
    )(x1d)


def swish(x, *, target_block_bytes=2 * _MIB, donate_input=False):
    """Elementwise swish y = x * sigmoid(x) via a Pallas TPU kernel."""
    if x.size == 0:
        return x
    # 12 MiB cap keeps 4x block bytes + margin inside v7x's 64 MiB VMEM.
    target_block_bytes = int(max(128 * 1024, min(target_block_bytes, 12 * _MIB)))

    x_flat = x.reshape(-1)
    n = x_flat.shape[0]
    lane = _pick_lane(n)
    if lane is not None:
        out = _run_2d(x_flat.reshape(n // lane, lane), target_block_bytes, donate_input)
    else:
        out = _run_1d(x_flat, target_block_bytes, donate_input)
    return out.reshape(x.shape)


if __name__ == "__main__":
    key = jax.random.PRNGKey(0)
    k1, k2, k3, k4 = jax.random.split(key, 4)

    # NCHW activation, matching the PyTorch module's typical usage.
    x = jax.random.normal(k1, (2, 4, 16, 16), dtype=jnp.float32)
    y = swish(x)
    jax.block_until_ready(y)
    ref = x * jax.nn.sigmoid(x)
    assert y.shape == x.shape and y.dtype == x.dtype
    assert jnp.allclose(y, ref, atol=1e-6, rtol=1e-6)

    # Multi-step aligned path (small block target forces >= 4 pipelined steps).
    x_big = jax.random.normal(k2, (4, 16, 64, 64), dtype=jnp.float32)
    y_big = swish(x_big, target_block_bytes=128 * 1024)
    jax.block_until_ready(y_big)
    assert jnp.allclose(y_big, x_big * jax.nn.sigmoid(x_big), atol=1e-6, rtol=1e-6)

    # Ragged size (not a multiple of 128): single pallas_call, masked edge block.
    x_rag = jax.random.normal(k3, (3, 11, 1000), dtype=jnp.float32)
    y_rag = swish(x_rag, target_block_bytes=128 * 1024)
    jax.block_until_ready(y_rag)
    assert jnp.allclose(y_rag, x_rag * jax.nn.sigmoid(x_rag), atol=1e-6, rtol=1e-6)

    # bf16 path (f32 compute, EUP exp + approximate reciprocal).
    x_bf = jax.random.normal(k4, (2, 8, 128), dtype=jnp.bfloat16)
    y_bf = swish(x_bf)
    jax.block_until_ready(y_bf)
    xf = x_bf.astype(jnp.float32)
    ref_bf = xf * jax.nn.sigmoid(xf)
    assert y_bf.dtype == jnp.bfloat16
    assert jnp.allclose(y_bf.astype(jnp.float32), ref_bf, atol=3e-2, rtol=3e-2)

    print("KERNEL_OK")
</pallas_src>

<mosaic_0001>
module attributes {stable_mosaic.version = 11 : i64} {
  func.func @_swish_kernel(%arg0: i32, %arg1: memref<1x2048xf32, #tpu.memory_space<vmem>>, %arg2: memref<1x2048xf32, #tpu.memory_space<vmem>>) attributes {dimension_semantics = [#tpu.dimension_semantics<parallel>], iteration_bounds = array<i64: 1>, scalar_prefetch = 0 : i64, scratch_operands = 0 : i64, tpu.core_type = #tpu.core_type<tc>, window_params = [{transform_indices = @transform_0, window_bounds = array<i64: 1, 2048>}, {transform_indices = @transform_1, window_bounds = array<i64: 1, 2048>}]} {
    %c0 = arith.constant 0 : index
    %c0_0 = arith.constant 0 : index
    %0 = vector.load %arg1[%c0, %c0_0] : memref<1x2048xf32, #tpu.memory_space<vmem>>, vector<1x2048xf32>
    %1 = arith.negf %0 : vector<1x2048xf32>
    %2 = math.exp %1 : vector<1x2048xf32>
    %cst = arith.constant 1.000000e+00 : f32
    %3 = vector.broadcast %cst : f32 to vector<1x2048xf32>
    %4 = arith.addf %3, %2 : vector<1x2048xf32>
    %5 = arith.divf %3, %4 : vector<1x2048xf32>
    %6 = arith.mulf %0, %5 : vector<1x2048xf32>
    %c0_1 = arith.constant 0 : index
    %c0_2 = arith.constant 0 : index
    %7 = vector.load %arg2[%c0_1, %c0_2] : memref<1x2048xf32, #tpu.memory_space<vmem>>, vector<1x2048xf32>
    tpu.vector_store %arg2[%c0_1, %c0_2], %6 {strides = array<i32>} : memref<1x2048xf32, #tpu.memory_space<vmem>>, vector<1x2048xf32>,
    return
  }
  func.func @transform_0(%arg0: i32) -> (i32, i32) {
    %c0_i32 = arith.constant 0 : i32
    %c0_i32_0 = arith.constant 0 : i32
    return %arg0, %c0_i32 : i32, i32
  }
  func.func @transform_1(%arg0: i32) -> (i32, i32) {
    %c0_i32 = arith.constant 0 : i32
    %c0_i32_0 = arith.constant 0 : i32
    return %arg0, %c0_i32 : i32, i32
  }
}

</mosaic_0001>

<bundles_post_ra>
// kernel: tpu_custom_call.1
= control target key start
LH: loop header
LB: loop body
LE: loop exit
PB: predicated region body
PF: predicated region fallthrough
CT: control target
= control target key end

     0   :  { %6 = vsyncpa [#allocation3], 0  ;;  %s128_s0 = inlined_call_operand.hbm [shape: f32[1,2048], index: 0, kind: input, shape index: {}]   ;;  %s129_s1 = inlined_call_operand.hbm [shape: f32[1,2048], index: 1, kind: output, shape index: {}]  }
   0x1   :  { %7 = vsyncpa [#allocation4], 0  ;;  %s110_s6 = smov [#allocation2]  }
   0x2   :  { %s14_s7 = sshll.u32 %s110_s6, 4  ;;  %s15_s7 = int_to_ptr.vmem [resolvable:$true] %s14_s7 }
   0x3   :  { %s74_s8 = scalar_lea.vmem %s15_s7, 256  ;;  %p79_p1 = scmp.lt.s32.totalorder %s15_s7, %s15_s7 }
   0x4   :  { %p75_p0 = scmp.ne.s32.totalorder %s15_s7, %s74_s8  ;;  %p80_p2 = scmp.lt.s32.totalorder %s74_s8, %s74_s8 }
   0x6   :  { %p81_p3 = por %p80_p2, %p79_p1 }
   0x8   :  { %p82_p4 = pnand %p81_p3, %p75_p0 }
   0xa   :  { %85 = shalt.err (!%p82_p4)
}
   0xb   :  { %17 = dma.hbm_to_vmem [thread:$0]  %s128_s0, 256, %s15_s7, [#allocation3]  }
   0xc   :  { %106 = dma.done.wait [#allocation3], 256  }
   0xd   :  { %107 = vsyncadd [#allocation3], 4294967040  ;;  %v21_v0 = vld [vmem:[#allocation2] sm:$0xff]  ;;  %v22_v1 = vld [vmem:[#allocation2 + $0x8] sm:$0xff]  ;;  %s111_s11 = smov [#allocation5]  }
   0xe   :  { %v54_v2 = vmul.f32 -1.442695, %v21_v0  ;;  %v55_v3 = vmul.f32 -1.442695, %v22_v1  ;;  %s45_s12 = sshll.u32 %s111_s11, 4  ;;  %s46_s12 = int_to_ptr.vmem [resolvable:$true] %s45_s12 }
   0xf   :  { %s86_s0 = scalar_lea.vmem %s46_s12, 256  ;;  %p91_p6 = scmp.lt.s32.totalorder %s46_s12, %s46_s12 }
  0x10   :  { %58 = vpow2.f32 %v54_v2  ;;  %p87_p5 = scmp.ne.s32.totalorder %s46_s12, %s86_s0  ;;  %p92_p7 = scmp.lt.s32.totalorder %s86_s0, %s86_s0 }
  0x11   :  { %60 = vpow2.f32 %v55_v3 }
  0x12   :  { %p93_p8 = por %p92_p7, %p91_p6 }
  0x14   :  { %p94_p9 = pnand %p93_p8, %p87_p5 }
  0x1d   :  { %v59_v4 = vpop.eup %58 }
  0x1e   :  { %v61_v5 = vpop.eup %60  ;;  %v29_v6 = vadd.f32 1.0, %v59_v4 }
  0x1f   :  { %v30_v7 = vadd.f32 1.0, %v61_v5 }
  0x20   :  { %62 = vrcp.f32 %v29_v6 }
  0x21   :  { %64 = vrcp.f32 %v30_v7 }
  0x2d   :  { %v63_v8 = vpop.eup %62 }
  0x2e   :  { %v65_v9 = vpop.eup %64  ;;  %v35_v10 = vmul.f32 %v63_v8, %v21_v0 }
  0x2f   :  { %v36_v11 = vmul.f32 %v65_v9, %v22_v1 }
  0x30   :  { %37 = vst [vmem:[#allocation5] sm:$0xff] %v35_v10 }
  0x31   :  { %38 = vst [vmem:[#allocation5 + $0x8] sm:$0xff] %v36_v11 }
  0x32   :  { %97 = shalt.err (!%p94_p9)
}
  0x33   :  { %48 = dma.vmem_to_hbm [thread:$0]  %s46_s12, 256, %s129_s1, [#allocation4]  }
  0x34   :  { %108 = dma.done.wait [#allocation4], 256  }
  0x35   :  { %109 = vsyncadd [#allocation4], 4294967040 }
  0x36   :  { %52 = vsyncpa [#allocation3], 1 }
  0x37   :  { %53 = vsyncpa [#allocation4], 1 }

</bundles_post_ra>
